<compile_context>
chip_gen: v5e
topology: v5e:2x2
jax: 0.10.0
libtpu: 0.0.40
codegen_flags: <defaults>
</compile_context>

<pallas_src>
import functools
import math

import jax
import jax.numpy as jnp
from jax.experimental import pallas as pl
from jax.experimental.pallas import tpu as pltpu


# Budget for (double-buffered input block) + (f32 cast & square intermediates).
# Conservative enough to fit v5e's 16 MiB scoped-VMEM default with headroom.
_VMEM_WORKING_SET_BYTES = 12 * 1024 * 1024


def _cdiv(a, b):
    return -(-a // b)


def _round_down(x, m):
    return (x // m) * m


def _sublane_packing(dtype):
    # Rows per native sublane-packed tile: f32 -> 8, bf16 -> 16, 8-bit -> 32.
    return {1: 32, 2: 16, 4: 8}.get(jnp.dtype(dtype).itemsize, 8)


def _lane_fold_factor(n, c):
    """k such that reshaping (n, c) -> (n // k, k * c) is free and lane-dense."""
    if c % 128 == 0:
        return 1
    k = 128 // math.gcd(c, 128)
    if k > 1 and n % k == 0 and k * c <= 8192:
        return k
    return 1


def _tensorcores_per_device():
    try:
        kind = (jax.devices()[0].device_kind or "").lower()
    except Exception:
        return 1
    # Chips whose two TensorCores sit behind a single JAX device. v5e/v6e have
    # one TensorCore per device, so splitting buys nothing there.
    if "v7" in kind or "v4" in kind or "v5p" in kind:
        return 2
    return 1


def _colsumsq_kernel(d_ref, out_ref, *, n_rows, tn, tiles_per_split):
    """Accumulates per-column sums of squares of the (folded) input.

    d_ref:   (tn, CF) tile of the folded input (boundary tiles may contain
             out-of-bounds rows -- there is NO wrapper-side padding).
    out_ref: (8, CF) f32 per-split accumulator (leading split dim squeezed);
             stays resident in VMEM across the reduction axis.
    """
    s = pl.program_id(0)   # split ("parallel") axis
    i = pl.program_id(1)   # N-tile ("arbitrary") reduction axis

    @pl.when(i == 0)
    def _():
        out_ref[...] = jnp.zeros_like(out_ref)

    # Global row offset of this tile. Rows >= n_rows (ragged tail / clamped
    # overflow tiles of the last split) hold unspecified data and must be
    # masked before the square/accumulate.
    row0 = (s * tiles_per_split + i) * tn
    row_ids = row0 + jax.lax.broadcasted_iota(jnp.int32, (tn, 1), 0)
    valid = row_ids < n_rows

    d = d_ref[...].astype(jnp.float32)
    sq = jnp.where(valid, d * d, 0.0)

    if tn % 8 == 0:
        # Sublane-aligned partial reduction: pure VALU adds of 8-row slabs per
        # tile; the single cross-sublane collapse happens once, in the jnp
        # epilogue outside the kernel.
        out_ref[...] += jnp.sum(sq.reshape(tn // 8, 8, sq.shape[-1]), axis=0)
    else:
        # tn equals the full (small) row count of the array -> single tile;
        # a one-off cross-sublane reduce into sublane 0 is negligible here.
        out_ref[0:1, :] += jnp.sum(sq, axis=0, keepdims=True)


def d_constraint1(d, *, min_pallas_bytes=1 << 18, tile_rows=None, num_splits=None):
    """Frobenius norm of (d^T d) * I - I for d of shape (N, C)."""
    n, c = d.shape
    itemsize = jnp.dtype(d.dtype).itemsize

    # Tiny inputs: kernel-launch + grid-step overhead dominates; plain XLA is
    # as fast or faster.
    if n * c * itemsize < min_pallas_bytes:
        df = d.astype(jnp.float32)
        colsq = jnp.sum(df * df, axis=0)
        return jnp.sqrt(jnp.sum((colsq - 1.0) ** 2))

    # Lane-dense folding for narrow C: (N, C) -> (N // k, k * C). Row-major
    # reshape is free; skipped when N % k != 0 (never pad -> never copy).
    k = _lane_fold_factor(n, c)
    d_fold = d.reshape(n // k, k * c) if k > 1 else d
    nf, cf = d_fold.shape

    # Adaptive row tile: as large as possible while the double-buffered input
    # (2 * tn * cf * itemsize) plus the f32 cast/square intermediates
    # (~2 * tn * cf * 4) stay inside the working-set budget.
    sub = _sublane_packing(d.dtype)
    denom = cf * (2 * itemsize + 2 * 4)
    tn_budget = max(sub, _round_down(_VMEM_WORKING_SET_BYTES // denom, sub))
    if tile_rows is not None:
        tn_budget = max(sub, _round_down(min(int(tile_rows), tn_budget), sub))
    # Single full-array block when it fits (minimizes grid steps); otherwise a
    # sublane-packed multiple with the ragged tail masked in-kernel.
    tn = nf if nf <= tn_budget else tn_budget

    total_tiles = _cdiv(nf, tn)
    if num_splits is None:
        num_splits = _tensorcores_per_device()
    num_splits = max(1, min(int(num_splits), total_tiles))
    tiles_per_split = _cdiv(total_tiles, num_splits)
    last_block = total_tiles - 1

    kernel = functools.partial(
        _colsumsq_kernel, n_rows=nf, tn=tn, tiles_per_split=tiles_per_split)

    partials = pl.pallas_call(
        kernel,
        out_shape=jax.ShapeDtypeStruct((num_splits, 8, cf), jnp.float32),
        grid_spec=pltpu.PrefetchScalarGridSpec(
            num_scalar_prefetch=0,
            grid=(num_splits, tiles_per_split),
            in_specs=[
                pl.BlockSpec(
                    (tn, cf),
                    # Clamp so an overflow tile of the last split never issues
                    # a fully out-of-bounds DMA; its rows are masked in-kernel
                    # (row0 is computed unclamped), so nothing is double-counted.
                    lambda s, i: (jnp.minimum(s * tiles_per_split + i, last_block), 0),
                ),
            ],
            out_specs=pl.BlockSpec((None, 8, cf), lambda s, i: (s, 0, 0)),
        ),
        compiler_params=pltpu.CompilerParams(
            dimension_semantics=("parallel", "arbitrary"),
            vmem_limit_bytes=32 * 1024 * 1024,
        ),
        cost_estimate=pl.CostEstimate(
            flops=2 * n * c,
            transcendentals=0,
            bytes_accessed=n * c * itemsize + num_splits * 8 * cf * 4,
        ),
    )(d_fold)

    # O(C) epilogue in plain jnp: collapse sublanes, splits and lane folds,
    # subtract the identity diagonal, then the Frobenius norm.
    colsq = partials.sum(axis=(0, 1)).reshape(k, c).sum(axis=0)
    return jnp.sqrt(jnp.sum((colsq - 1.0) ** 2))


def d_constraint1_ref(d):
    d = d.astype(jnp.float32)
    c = d.shape[1]
    eye = jnp.eye(c, dtype=jnp.float32)
    g = jnp.dot(d.T, d, precision=jax.lax.Precision.HIGHEST)
    m = g * eye - eye
    return jnp.sqrt(jnp.sum(m * m))


if __name__ == "__main__":
    # Small shape consistent with the module's 2-D input: batch=16, features=32.
    d = jax.random.normal(jax.random.PRNGKey(0), (16, 32), dtype=jnp.float32)
    loss = d_constraint1(d, min_pallas_bytes=0)   # force the Pallas path
    jax.block_until_ready(loss)
    ref = d_constraint1_ref(d)
    assert jnp.allclose(loss, ref, rtol=1e-5, atol=1e-5), (loss, ref)

    # Ragged N (in-kernel tail mask, no wrapper pad), C not a multiple of 128,
    # multi-tile grid and the 2-split (dual TensorCore) code path.
    d2 = jax.random.normal(jax.random.PRNGKey(1), (1030, 96), dtype=jnp.float32)
    loss2 = d_constraint1(d2, min_pallas_bytes=0, tile_rows=256, num_splits=2)
    jax.block_until_ready(loss2)
    ref2 = d_constraint1_ref(d2)
    assert jnp.allclose(loss2, ref2, rtol=1e-4, atol=1e-4), (loss2, ref2)

    # bf16 streamed natively through the DMA, f32 accumulation in-kernel.
    d3 = jax.random.normal(jax.random.PRNGKey(2), (2048, 256), dtype=jnp.bfloat16)
    loss3 = d_constraint1(d3)
    jax.block_until_ready(loss3)
    ref3 = d_constraint1_ref(d3)
    assert jnp.allclose(loss3, ref3, rtol=2e-3, atol=1e-2), (loss3, ref3)

    print("KERNEL_OK")
</pallas_src>

<mosaic_0001>
module attributes {stable_mosaic.version = 11 : i64} {
  func.func @_colsumsq_kernel(%arg0: i32, %arg1: i32, %arg2: memref<4x128xf32, #tpu.memory_space<vmem>>, %arg3: memref<1x8x128xf32, #tpu.memory_space<vmem>>) attributes {dimension_semantics = [#tpu.dimension_semantics<parallel>, #tpu.dimension_semantics<arbitrary>], iteration_bounds = array<i64: 1, 1>, scalar_prefetch = 0 : i64, scratch_operands = 0 : i64, tpu.core_type = #tpu.core_type<tc>, window_params = [{transform_indices = @transform_0, window_bounds = array<i64: 4, 128>}, {transform_indices = @transform_1, window_bounds = array<i64: 1, 8, 128>}]} {
    %c0_i32 = arith.constant 0 : i32
    %0 = arith.cmpi eq, %arg1, %c0_i32 : i32
    %1 = arith.extui %0 : i1 to i32
    %c0_i32_0 = arith.constant 0 : i32
    %2 = arith.cmpi ne, %1, %c0_i32_0 : i32
    scf.if %2 {
      %cst_10 = arith.constant 0.000000e+00 : f32
      %25 = vector.broadcast %cst_10 : f32 to vector<8x128xf32>
      %c0_11 = arith.constant 0 : index
      %c0_12 = arith.constant 0 : index
      %c0_13 = arith.constant 0 : index
      %26 = vector.load %arg3[%c0_11, %c0_12, %c0_13] : memref<1x8x128xf32, #tpu.memory_space<vmem>>, vector<1x8x128xf32>
      %27 = vector.shape_cast %26 : vector<1x8x128xf32> to vector<8x128xf32>
      %28 = vector.shape_cast %25 : vector<8x128xf32> to vector<1x8x128xf32>
      tpu.vector_store %arg3[%c0_11, %c0_12, %c0_13], %28 {strides = array<i32>} : memref<1x8x128xf32, #tpu.memory_space<vmem>>, vector<1x8x128xf32>,
    } else {
    }
    %c1_i32 = arith.constant 1 : i32
    %3 = arith.muli %arg0, %c1_i32 : i32
    %4 = arith.addi %3, %arg1 : i32
    %c4_i32 = arith.constant 4 : i32
    %5 = arith.muli %4, %c4_i32 : i32
    %6 = tpu.iota {dimensions = array<i32: 0>} : vector<4x1xi32>
    %7 = vector.broadcast %5 : i32 to vector<4x1xi32>
    %8 = arith.addi %7, %6 : vector<4x1xi32>
    %c4_i32_1 = arith.constant 4 : i32
    %9 = vector.broadcast %c4_i32_1 : i32 to vector<4x1xi32>
    %10 = arith.cmpi slt, %8, %9 : vector<4x1xi32>
    %c0 = arith.constant 0 : index
    %c0_2 = arith.constant 0 : index
    %11 = vector.load %arg2[%c0, %c0_2] : memref<4x128xf32, #tpu.memory_space<vmem>>, vector<4x128xf32>
    %12 = arith.mulf %11, %11 : vector<4x128xf32>
    %cst = arith.constant 0.000000e+00 : f32
    %13 = vector.shape_cast %10 : vector<4x1xi1> to vector<4x1xi1>
    %14 = vector.broadcast %13 : vector<4x1xi1> to vector<4x128xi1>
    %15 = vector.broadcast %cst : f32 to vector<4x128xf32>
    %16 = arith.select %14, %12, %15 : vector<4x128xi1>, vector<4x128xf32>
    %c0_3 = arith.constant 0 : index
    %c0_4 = arith.constant 0 : index
    %c0_5 = arith.constant 0 : index
    %17 = vector.load %arg3[%c0_3, %c0_4, %c0_5] : memref<1x8x128xf32, #tpu.memory_space<vmem>>, vector<1x1x128xf32>
    %18 = vector.shape_cast %17 : vector<1x1x128xf32> to vector<1x128xf32>
    %cst_6 = arith.constant dense<0.000000e+00> : vector<128xf32>
    %19 = vector.multi_reduction <add>, %16, %cst_6 [0] : vector<4x128xf32> to vector<128xf32>
    %20 = vector.shape_cast %19 : vector<128xf32> to vector<1x128xf32>
    %21 = arith.addf %18, %20 : vector<1x128xf32>
    %c0_7 = arith.constant 0 : index
    %c0_8 = arith.constant 0 : index
    %c0_9 = arith.constant 0 : index
    %22 = vector.load %arg3[%c0_7, %c0_8, %c0_9] : memref<1x8x128xf32, #tpu.memory_space<vmem>>, vector<1x1x128xf32>
    %23 = vector.shape_cast %22 : vector<1x1x128xf32> to vector<1x128xf32>
    %24 = vector.shape_cast %21 : vector<1x128xf32> to vector<1x1x128xf32>
    tpu.vector_store %arg3[%c0_7, %c0_8, %c0_9], %24 {strides = array<i32>} : memref<1x8x128xf32, #tpu.memory_space<vmem>>, vector<1x1x128xf32>,
    return
  }
  func.func @transform_0(%arg0: i32, %arg1: i32) -> (i32, i32) {
    %c1_i32 = arith.constant 1 : i32
    %0 = arith.muli %arg0, %c1_i32 : i32
    %1 = arith.addi %0, %arg1 : i32
    %c0_i32 = arith.constant 0 : i32
    %2 = arith.minsi %1, %c0_i32 : i32
    %c0_i32_0 = arith.constant 0 : i32
    %c0_i32_1 = arith.constant 0 : i32
    return %2, %c0_i32_0 : i32, i32
  }
  func.func @transform_1(%arg0: i32, %arg1: i32) -> (i32, i32, i32) {
    %c0_i32 = arith.constant 0 : i32
    %c0_i32_0 = arith.constant 0 : i32
    %c0_i32_1 = arith.constant 0 : i32
    return %arg0, %c0_i32, %c0_i32_0 : i32, i32, i32
  }
}

</mosaic_0001>

<bundles_post_ra>
// kernel: tpu_custom_call.1
= control target key start
LH: loop header
LB: loop body
LE: loop exit
PB: predicated region body
PF: predicated region fallthrough
CT: control target
= control target key end

     0   :  { %6 = vsyncpa [#allocation3], 0  ;;  %s152_s0 = inlined_call_operand.hbm [shape: f32[4,128], index: 0, kind: input, shape index: {}]   ;;  %s153_s1 = inlined_call_operand.hbm [shape: f32[1,8,128], index: 1, kind: output, shape index: {}]  }
   0x1   :  { %7 = vsyncpa [#allocation4], 0  ;;  %s18_s8 = sshll.u32 %s152_s0, 4  ;;  %s133_s9 = smov [#allocation2]   ;;  %s19_s8 = int_to_ptr.hbm [resolvable:$true] %s18_s8 }
   0x2   :  { %s20_s10 = sshll.u32 %s133_s9, 4  ;;  %s21_s10 = int_to_ptr.vmem [resolvable:$true] %s20_s10 }
   0x3   :  { %23 = dma.hbm_to_vmem [thread:$0]  %s19_s8, 64, %s21_s10, [#allocation3]  }
   0x4   :  { %129 = dma.done.wait [#allocation3], 64  }
   0x5   :  { %130 = vsyncadd [#allocation3], 4294967232  ;;  %v38_v0 = vlaneseq  ;;  %v134_v1 = vmov 0.0   ;;  %v43_v3 = vld [vmem:[#allocation2] sm:$0xf]  ;;  %vm49_vm1 = vcmask 1043456  }
   0x6   :  { %35 = vst [vmem:[#allocation5] sm:$0xff] %v134_v1  ;;  %v44_v4 = vmul.f32 %v43_v3, %v43_v3  ;;  %s135_s0 = smov [#allocation5]   ;;  %s66_s14 = sshll.u32 %s153_s1, 4  ;;  %s67_s14 = int_to_ptr.hbm [resolvable:$true] %s66_s14 }
   0x7   :  { %v39_v2 = vshrl.u32 %v38_v0, 7  ;;  %s64_s11 = sshll.u32 %s135_s0, 4  ;;  %s65_s11 = int_to_ptr.vmem [resolvable:$true] %s64_s11 }
   0x9   :  { %vm42_vm0 = vcmp.lt.s32.totalorder %v39_v2, 4 }
   0xa   :  { %v47_v5 = vsel %vm42_vm0, %v44_v4, 0.0 }
   0xb   :  { %v50_v6 = vsel %vm49_vm1, %v47_v5, 0.0 }
   0xc   :  { %v51_v7 = vrot.slane %v50_v6, 4 }
   0xd   :  { %v48_v12 = vld [vmem:[#allocation5] sm:$0x1] }
   0xe   :  { %v52_v8 = vadd.f32 %v51_v7, %v50_v6 }
  0x10   :  { %v53_v9 = vrot.slane %v52_v8, 2 }
  0x12   :  { %v54_v10 = vadd.f32 %v53_v9, %v52_v8 }
  0x14   :  { %v55_v11 = vrot.slane %v54_v10, 1 }
  0x16   :  { %v56_v13 = vadd.f32 %v55_v11, %v54_v10 }
  0x18   :  { %v57_v14 = vadd.f32 %v56_v13, %v48_v12 }
  0x1a   :  { %58 = vst [vmem:[#allocation5] sm:$0x1] %v57_v14 }
  0x1b   :  { %69 = dma.vmem_to_hbm [thread:$0]  %s65_s11, 128, %s67_s14, [#allocation4]  }
  0x1c   :  { %131 = dma.done.wait [#allocation4], 128  }
  0x1d   :  { %132 = vsyncadd [#allocation4], 4294967168 }
  0x1e   :  { %74 = vsyncpa [#allocation3], 1 }
  0x1f   :  { %75 = vsyncpa [#allocation4], 1 }

</bundles_post_ra>
